<compile_context>
chip_gen: v5e
topology: v5e:2x2
jax: 0.10.0
libtpu: 0.0.40
codegen_flags: <defaults>
</compile_context>

<pallas_src>
import jax
import jax.numpy as jnp
from jax import lax
from jax.experimental import pallas as pl
from jax.experimental.pallas import tpu as pltpu

EPS = 1e-10


def _distance_kernel(support_ref, queries_ref, out_ref):
    # support_ref: (S*B, D) with rows ordered (s, b) row-major (row = s*B + b)
    # queries_ref: (B, N, D)
    # out_ref:     (B, N, S)
    batch = queries_ref.shape[0]
    n_support = out_ref.shape[2]

    # B is tiny & static in matching networks; an unrolled per-batch loop of 2-D
    # MXU matmuls is the most robust lowering (no 3-D transposes / batched
    # dot_general with non-leading batch dims).
    # TODO(synk): if B ever grows large, move it onto a grid axis instead of
    # unrolling, and re-derive tile sizes against per-generation scoped VMEM
    # (32 MiB default on v7x, 16 MiB on v5e) via pltpu.CompilerParams.
    for b in range(batch):
        # Sublane-strided load of batch-b support rows: (S, D), directly in the
        # layout the matmul wants (replaces the old wrapper transpose).
        sup_b = support_ref[pl.ds(b, n_support, stride=batch), :].astype(jnp.float32)
        q_b = queries_ref[b].astype(jnp.float32)                       # (N, D)

        # clamp(eps, inf).rsqrt() of the support row norms (EUP), shape (S, 1).
        sum_support = jnp.sum(sup_b * sup_b, axis=-1, keepdims=True)   # (S, 1) XLU reduce
        mag = lax.rsqrt(jnp.maximum(sum_support, EPS))                 # (S, 1) EUP

        # Fold the per-support-row normalization into the matmul operand so the
        # (S, 1) magnitude broadcasts along lanes — no transpose anywhere.
        sup_scaled = sup_b * mag                                       # (S, D) VPU

        # cosine[n, s] = q_b[n, :] . sup_scaled[s, :]   ->  MXU matmul.
        cos = jnp.einsum("nd,sd->ns", q_b, sup_scaled,
                         preferred_element_type=jnp.float32)           # (N, S)

        # TODO(synk): if S (the output lane dim) ever scales, keep it a multiple
        # of 128 for unmasked lane-dense stores; at S=8 masked stores are free.
        out_ref[b] = cos.astype(out_ref.dtype)


def distance_network_batched(support_set, input_images):
    """support_set: [S, B, D], input_images: [B, N, D] -> [B, N, S] cosine sims."""
    S, B, D = support_set.shape
    Bq, N, Dq = input_images.shape
    assert (Bq, Dq) == (B, D), (input_images.shape, support_set.shape)

    # Row-major collapse (S, B, D) -> (S*B, D): a bitcast, no data movement, so
    # nothing like the old standalone transpose HLO exists outside the kernel.
    support_flat = support_set.reshape(S * B, D)

    # Whole problem fits comfortably in VMEM: single gridless call, whole-array
    # refs, no pipeline machinery.
    return pl.pallas_call(
        _distance_kernel,
        out_shape=jax.ShapeDtypeStruct((B, N, S), jnp.float32),
        in_specs=[
            pl.BlockSpec(memory_space=pltpu.MemorySpace.VMEM),
            pl.BlockSpec(memory_space=pltpu.MemorySpace.VMEM),
        ],
        out_specs=pl.BlockSpec(memory_space=pltpu.MemorySpace.VMEM),
    )(support_flat, input_images)


def distance_network(support_set, input_image):
    """Module-faithful forward: support_set [S, B, D], input_image [B, D] -> [B, S]."""
    # Unit-dim expand/squeeze are degenerate reshapes (bitcasts) — no extra HLO cost.
    out = distance_network_batched(support_set, input_image[:, None, :])
    return out[:, 0, :]


# ----------------------------- pure-JAX references -----------------------------

def _reference_batched(support_set, input_images):
    s = support_set.astype(jnp.float32)                      # (S, B, D)
    q = input_images.astype(jnp.float32)                     # (B, N, D)
    sum_support = jnp.sum(s * s, axis=-1)                    # (S, B)
    mag = 1.0 / jnp.sqrt(jnp.maximum(sum_support, EPS))      # (S, B)
    dot = jnp.einsum("bnd,sbd->bns", q, s,
                     precision=jax.lax.Precision.HIGHEST)    # (B, N, S)
    return dot * mag.T[:, None, :]


def _reference(support_set, input_image):
    return _reference_batched(support_set, input_image[:, None, :])[:, 0, :]


if __name__ == "__main__":
    key = jax.random.PRNGKey(0)
    k1, k2, k3 = jax.random.split(key, 3)

    seq_len, batch, dim = 8, 2, 64
    support_set = jax.random.normal(k1, (seq_len, batch, dim), dtype=jnp.float32)
    input_image = jax.random.normal(k2, (batch, dim), dtype=jnp.float32)

    # Module-faithful forward (one target embedding per batch element).
    out = jax.block_until_ready(distance_network(support_set, input_image))
    ref = _reference(support_set, input_image)
    assert out.shape == (batch, seq_len), out.shape
    assert jnp.allclose(out, ref, atol=1e-3, rtol=1e-3), (out, ref)

    # Batched-query entry point (the launch-amortizing / MXU path).
    n_queries = 16
    input_images = jax.random.normal(k3, (batch, n_queries, dim), dtype=jnp.float32)
    out_b = jax.block_until_ready(distance_network_batched(support_set, input_images))
    ref_b = _reference_batched(support_set, input_images)
    assert out_b.shape == (batch, n_queries, seq_len), out_b.shape
    assert jnp.allclose(out_b, ref_b, atol=1e-3, rtol=1e-3), (out_b, ref_b)

    print("KERNEL_OK")
</pallas_src>

<mosaic_0001>
module attributes {stable_mosaic.version = 11 : i64} {
  func.func @_distance_kernel(%arg0: memref<16x64xf32, #tpu.memory_space<vmem>>, %arg1: memref<2x1x64xf32, #tpu.memory_space<vmem>>, %arg2: memref<2x1x8xf32, #tpu.memory_space<vmem>>) attributes {dimension_semantics = [], scalar_prefetch = 0 : i64, scratch_operands = 0 : i64, tpu.core_type = #tpu.core_type<tc>} {
    %c0 = arith.constant 0 : index
    %c0_0 = arith.constant 0 : index
    %0 = tpu.strided_load %arg0[%c0, %c0_0] {strides = array<i32: 2, 1>} : memref<16x64xf32, #tpu.memory_space<vmem>>, vector<8x64xf32>
    %c0_1 = arith.constant 0 : index
    %c0_2 = arith.constant 0 : index
    %c0_3 = arith.constant 0 : index
    %1 = vector.load %arg1[%c0_1, %c0_2, %c0_3] : memref<2x1x64xf32, #tpu.memory_space<vmem>>, vector<1x1x64xf32>
    %2 = vector.shape_cast %1 : vector<1x1x64xf32> to vector<1x64xf32>
    %3 = arith.mulf %0, %0 : vector<8x64xf32>
    %cst = arith.constant dense<0.000000e+00> : vector<8xf32>
    %4 = vector.multi_reduction <add>, %3, %cst [1] : vector<8x64xf32> to vector<8xf32>
    %5 = vector.shape_cast %4 : vector<8xf32> to vector<8x1xf32>
    %cst_4 = arith.constant 1.000000e-10 : f32
    %6 = vector.broadcast %cst_4 : f32 to vector<8x1xf32>
    %7 = arith.maximumf %5, %6 : vector<8x1xf32>
    %8 = math.rsqrt %7 : vector<8x1xf32>
    %9 = vector.broadcast %8 : vector<8x1xf32> to vector<8x64xf32>
    %10 = arith.mulf %0, %9 : vector<8x64xf32>
    "tpu.trace_start"() <{level = 10 : i32, message = "nd,sd->ns"}> : () -> ()
    %cst_5 = arith.constant dense<0.000000e+00> : vector<1x8xf32>
    %11 = tpu.matmul %2, %10, %cst_5 {dimension_numbers = #tpu.dot_dimension_numbers<[1], [1], [0], [0], [0, 0, 1, 0], [], []>} : vector<1x64xf32>, vector<8x64xf32>, vector<1x8xf32> -> vector<1x8xf32>
    "tpu.trace_stop"() : () -> ()
    %c0_6 = arith.constant 0 : index
    %c0_7 = arith.constant 0 : index
    %c0_8 = arith.constant 0 : index
    %12 = vector.load %arg2[%c0_6, %c0_7, %c0_8] : memref<2x1x8xf32, #tpu.memory_space<vmem>>, vector<1x1x8xf32>
    %13 = vector.shape_cast %12 : vector<1x1x8xf32> to vector<1x8xf32>
    %14 = vector.shape_cast %11 : vector<1x8xf32> to vector<1x1x8xf32>
    tpu.vector_store %arg2[%c0_6, %c0_7, %c0_8], %14 {strides = array<i32>} : memref<2x1x8xf32, #tpu.memory_space<vmem>>, vector<1x1x8xf32>,
    %c1 = arith.constant 1 : index
    %c0_9 = arith.constant 0 : index
    %15 = tpu.strided_load %arg0[%c1, %c0_9] {strides = array<i32: 2, 1>} : memref<16x64xf32, #tpu.memory_space<vmem>>, vector<8x64xf32>
    %c1_10 = arith.constant 1 : index
    %c0_11 = arith.constant 0 : index
    %c0_12 = arith.constant 0 : index
    %16 = vector.load %arg1[%c1_10, %c0_11, %c0_12] : memref<2x1x64xf32, #tpu.memory_space<vmem>>, vector<1x1x64xf32>
    %17 = vector.shape_cast %16 : vector<1x1x64xf32> to vector<1x64xf32>
    %18 = arith.mulf %15, %15 : vector<8x64xf32>
    %cst_13 = arith.constant dense<0.000000e+00> : vector<8xf32>
    %19 = vector.multi_reduction <add>, %18, %cst_13 [1] : vector<8x64xf32> to vector<8xf32>
    %20 = vector.shape_cast %19 : vector<8xf32> to vector<8x1xf32>
    %cst_14 = arith.constant 1.000000e-10 : f32
    %21 = vector.broadcast %cst_14 : f32 to vector<8x1xf32>
    %22 = arith.maximumf %20, %21 : vector<8x1xf32>
    %23 = math.rsqrt %22 : vector<8x1xf32>
    %24 = vector.broadcast %23 : vector<8x1xf32> to vector<8x64xf32>
    %25 = arith.mulf %15, %24 : vector<8x64xf32>
    "tpu.trace_start"() <{level = 10 : i32, message = "nd,sd->ns"}> : () -> ()
    %cst_15 = arith.constant dense<0.000000e+00> : vector<1x8xf32>
    %26 = tpu.matmul %17, %25, %cst_15 {dimension_numbers = #tpu.dot_dimension_numbers<[1], [1], [0], [0], [0, 0, 1, 0], [], []>} : vector<1x64xf32>, vector<8x64xf32>, vector<1x8xf32> -> vector<1x8xf32>
    "tpu.trace_stop"() : () -> ()
    %c1_16 = arith.constant 1 : index
    %c0_17 = arith.constant 0 : index
    %c0_18 = arith.constant 0 : index
    %27 = vector.load %arg2[%c1_16, %c0_17, %c0_18] : memref<2x1x8xf32, #tpu.memory_space<vmem>>, vector<1x1x8xf32>
    %28 = vector.shape_cast %27 : vector<1x1x8xf32> to vector<1x8xf32>
    %29 = vector.shape_cast %26 : vector<1x8xf32> to vector<1x1x8xf32>
    tpu.vector_store %arg2[%c1_16, %c0_17, %c0_18], %29 {strides = array<i32>} : memref<2x1x8xf32, #tpu.memory_space<vmem>>, vector<1x1x8xf32>,
    return
  }
}

</mosaic_0001>

<bundles_post_ra>
// kernel: tpu_custom_call.1
= control target key start
LH: loop header
LB: loop body
LE: loop exit
PB: predicated region body
PF: predicated region fallthrough
CT: control target
= control target key end

     0   :  { %7 = vsyncpa [#allocation3], 0  ;;  %s295_s0 = inlined_call_operand.hbm [shape: f32[16,64], index: 0, kind: input, shape index: {}]   ;;  %s296_s1 = inlined_call_operand.hbm [shape: f32[2,1,64], index: 1, kind: input, shape index: {}]   ;;  %s297_s2 = inlined_call_operand.hbm [shape: f32[2,1,8], index: 2, kind: output, shape index: {}]  }
   0x1   :  { %8 = vsyncpa [#allocation6], 0 }
   0x2   :  { %9 = vsyncpa [#allocation4], 0  ;;  %s14_s11 = sshll.u32 %s295_s0, 4  ;;  %s252_s12 = smov [#allocation2]   ;;  %s15_s11 = int_to_ptr.hbm [resolvable:$true] %s14_s11 }
   0x3   :  { %s16_s13 = sshll.u32 %s252_s12, 4  ;;  %s27_s16 = sshll.u32 %s296_s1, 4  ;;  %s17_s13 = int_to_ptr.vmem [resolvable:$true] %s16_s13  ;;  %s28_s16 = int_to_ptr.hbm [resolvable:$true] %s27_s16 }
   0x4   :  { %s253_s17 = smov 128   ;;  %s254_s18 = smov 8  }
   0x5   :  { %22 = dma.hbm_to_vmem [thread:$0]  %s15_s11, 256, %s17_s13, [#allocation3], %s253_s17, %s253_s17, %s254_s18  }
   0x6   :  { %s255_s19 = smov [#allocation5]   ;;  %s256_s21 = smov 16  }
   0x7   :  { %s29_s20 = sshll.u32 %s255_s19, 4  ;;  %s257_s22 = smov 1   ;;  %s30_s20 = int_to_ptr.vmem [resolvable:$true] %s29_s20 }
   0x8   :  { %35 = dma.hbm_to_vmem [thread:$0]  %s28_s16, 32, %s30_s20, [#allocation6], %s256_s21, %s256_s21, %s257_s22  }
   0x9   :  { %246 = dma.done.wait [#allocation3], 256  }
   0xa   :  { %247 = vsyncadd [#allocation3], 4294967040 }
   0xb   :  { %248 = dma.done.wait [#allocation6], 32  }
   0xc   :  { %249 = vsyncadd [#allocation6], 4294967264  ;;  %v44_v0 = vld [vmem:[#allocation2] ss:$2 sm:$0xff]  ;;  %vm47_vm0 = vcmask 523264   ;;  %vm89_vm7 = vcmask 57344  }
   0xd   :  { %v46_v1 = vmul.f32 %v44_v0, %v44_v0  ;;  %v92_v2 = vld [vmem:[#allocation2 + $0x1] ss:$2 sm:$0xff]  ;;  %v45_v22 = vld [vmem:[#allocation5] sm:$0x1]  ;;  %v94_v27 = vld [vmem:[#allocation5 + $0x1] sm:$0x1] }
   0xe   :  { %v95_v4 = vmul.f32 %v92_v2, %v92_v2  ;;  %s258_s0 = smov [#allocation7]   ;;  %s145_s25 = sshll.u32 %s297_s2, 4  ;;  %s146_s25 = int_to_ptr.hbm [resolvable:$true] %s145_s25 }
   0xf   :  { %v48_v3 = vsel %vm47_vm0, %v46_v1, 0.0  ;;  %s143_s1 = sshll.u32 %s258_s0, 4  ;;  %s144_s1 = int_to_ptr.vmem [resolvable:$true] %s143_s1 }
  0x10   :  { %49 = vadd.xlane.f32.xlu0 %v48_v3  ;;  %v96_v5 = vsel %vm47_vm0, %v95_v4, 0.0 }
  0x18   :  { %97 = vadd.xlane.f32.xlu0 %v96_v5 }
  0x83   :  { %v50_v6 = vpop.xlane.xlu0 %49 }
  0x84   :  { %v51_v7 = vmax.f32 %v50_v6, 1e-10 }
  0x86   :  { %170 = vrsqrt.f32 %v51_v7  ;;  %vm58_vm2 = vweird.f32 %v51_v7 }
  0x8b   :  { %v98_v8 = vpop.xlane.xlu0 %97 }
  0x8c   :  { %v171_v9 = vpop.eup %170  ;;  %v99_v10 = vmax.f32 %v98_v8, 1e-10 }
  0x8d   :  { %v53_v11 = vmul.f32 %v171_v9, %v51_v7  ;;  %vm59_vm1 = vweird.f32 %v171_v9 }
  0x8e   :  { %172 = vrsqrt.f32 %v99_v10  ;;  %vm60_vm3 = vmor %vm58_vm2, %vm59_vm1  ;;  %vm106_vm5 = vweird.f32 %v99_v10 }
  0x8f   :  { %v54_v12 = vmul.f32 %v171_v9, %v53_v11 }
  0x91   :  { %v55_v13 = vmul.f32 0.5, %v54_v12 }
  0x93   :  { %v56_v14 = vsub.f32 1.5, %v55_v13 }
  0x94   :  { %v173_v15 = vpop.eup %172 }
  0x95   :  { %v101_v16 = vmul.f32 %v173_v15, %v99_v10  ;;  %v57_v17 = vmul.f32 %v171_v9, %v56_v14  ;;  %vm107_vm4 = vweird.f32 %v173_v15 }
  0x96   :  { %vm108_vm6 = vmor %vm106_vm5, %vm107_vm4 }
  0x97   :  { %v102_v18 = vmul.f32 %v173_v15, %v101_v16  ;;  %v61_v19 = vsel %vm60_vm3, %v171_v9, %v57_v17 }
  0x98   :  { %v62_v20 = vmul.f32 %v61_v19, %v44_v0 }
  0x99   :  { %v103_v21 = vmul.f32 0.5, %v102_v18 }
  0x9a   :  { %159 = vmatpush.xpose.msk.msra.mxu0 %vm47_vm0, %v62_v20 }
  0x9b   :  { %v104_v23 = vsub.f32 1.5, %v103_v21 }
  0x9d   :  { %v105_v24 = vmul.f32 %v173_v15, %v104_v23  ;;  %160 = vmatmul.msk.f32.vlgmr.msra.gmra.mxu0 %vm47_vm0, %v45_v22 }
  0x9f   :  { %v109_v25 = vsel %vm108_vm6, %v173_v15, %v105_v24 }
  0xa0   :  { %v110_v26 = vmul.f32 %v109_v25, %v92_v2 }
  0xa2   :  { %161 = vmatpush.xpose.msk.msra.mxu1 %vm47_vm0, %v110_v26 }
  0xa5   :  { %162 = vmatmul.msk.f32.vlgmr.msra.gmra.mxu1 %vm47_vm0, %v94_v27 }
 0x11a   :  { %v86_v28 = vpop.f32.mrf.mxu0 }
 0x11b   :  { %90 = vst.msk [vmem:[#allocation7] sm:$0x1] %vm89_vm7, %v86_v28 }
 0x122   :  { %v134_v29 = vpop.f32.mrf.mxu1 }
 0x123   :  { %138 = vst.msk [vmem:[#allocation7 + $0x1] sm:$0x1] %vm89_vm7, %v134_v29 }
 0x124   :  { %151 = dma.vmem_to_hbm [thread:$0]  %s144_s1, 32, %s146_s25, [#allocation4], %s256_s21, %s256_s21, %s257_s22  }
 0x125   :  { %250 = dma.done.wait [#allocation4], 32  }
 0x126   :  { %251 = vsyncadd [#allocation4], 4294967264 }
 0x127   :  { %156 = vsyncpa [#allocation3], 1 }
 0x128   :  { %157 = vsyncpa [#allocation6], 1 }
 0x129   :  { %158 = vsyncpa [#allocation4], 1 }

</bundles_post_ra>
